<compile_context>
chip_gen: v7x
topology: tpu7x:2x2x1
jax: 0.10.0
libtpu: 0.0.40
codegen_flags: <defaults>
</compile_context>

<pallas_src>
import numpy as np
import jax
import jax.numpy as jnp
from jax import lax
from jax.experimental import pallas as pl
from jax.experimental.pallas import tpu as pltpu

B = 2        # samples per forward (torch batch)
L_IN = 50    # 50 -> 48 -> 47 -> 46 -> pool 23 -> 22 -> pool 11 (16*11 = 176)
C = 16       # conv channels

# ---- packed-constant slab column offsets (must match prepare_params) ----
_W1A, _W1B, _W1C = 0, 8, 16            # conv1 taps, each (32, 2)
_B1, _B2, _B3, _B4 = 24, 25, 26, 27    # tiled conv biases (one column each)
_BE, _MSK = 32, 40                     # folded classifier bias row / batch-parity mask
_W2A, _W2B = 128, 256                  # conv2 taps, each (32, 32), 128-lane aligned
_W3A, _W3B = 384, 512
_W4A, _W4B = 640, 768
_VF = 896                              # folded pool2+classifier weights (32, 41)
_NCOL = 1024


# ------------------------------ Pallas kernel ------------------------------ #

def fused_kernel(x_ref, noise_ref, w_ref, out_ref):
    def dot(a, b):
        return jnp.dot(a, b, preferred_element_type=jnp.float32)

    x = x_ref[0]                                                 # (B, 50)
    nz = noise_ref[0]                                            # (B, 50)

    # conv_block_1a taps on x and noise SEPARATELY (conv is linear): the std
    # reduce below overlaps with these MXU dots instead of gating them.
    hx = (dot(w_ref[:, _W1A:_W1A + B], x[:, 0:48])
          + dot(w_ref[:, _W1B:_W1B + B], x[:, 1:49])
          + dot(w_ref[:, _W1C:_W1C + B], x[:, 2:50]))
    hn = (dot(w_ref[:, _W1A:_W1A + B], nz[:, 0:48])
          + dot(w_ref[:, _W1B:_W1B + B], nz[:, 1:49])
          + dot(w_ref[:, _W1C:_W1C + B], nz[:, 2:50]))

    # torch.std(x): unbiased, over this forward's whole (B, 50) input
    n = x.shape[0] * x.shape[1]
    mean = jnp.sum(x, keepdims=True) / n
    var = jnp.sum((x - mean) ** 2, keepdims=True) / (n - 1)
    scale = 2.0 * jnp.sqrt(var)                                  # snr = 1.0

    # conv_block_1a combine + ReLU
    h = jnp.maximum(hx + scale * hn + w_ref[:, _B1:_B1 + 1], 0.0)          # (32, 48)

    # conv_block_1b: Conv1d(16,16,2) + ReLU — split taps (no sublane concat)
    h = jnp.maximum(dot(w_ref[:, _W2A:_W2A + 32], h[:, 0:47])
                    + dot(w_ref[:, _W2B:_W2B + 32], h[:, 1:48])
                    + w_ref[:, _B2:_B2 + 1], 0.0)                          # (32, 47)

    # conv_block_2 conv: Conv1d(16,16,2) + ReLU
    h = jnp.maximum(dot(w_ref[:, _W3A:_W3A + 32], h[:, 0:46])
                    + dot(w_ref[:, _W3B:_W3B + 32], h[:, 1:47])
                    + w_ref[:, _B3:_B3 + 1], 0.0)                          # (32, 46)

    # MaxPool1d(2) kept IMPLICIT: valid pooled values sit at even columns of m1
    m1 = jnp.maximum(h[:, 0:45], h[:, 1:46])                               # (32, 45)

    # conv_block_3 conv on the implicit pool: taps hit m1 at lane offsets 0 and
    # 2, so no lane-compaction matmul is needed (valid outputs at even columns)
    full = jnp.maximum(dot(w_ref[:, _W4A:_W4A + 32], m1[:, 0:43])
                       + dot(w_ref[:, _W4B:_W4B + 32], m1[:, 2:45])
                       + w_ref[:, _B4:_B4 + 1], 0.0)                       # (32, 43)

    # MaxPool1d(2) + Flatten + Linear(176,128) + Linear(128,1) + Sigmoid.
    # The two Linears have NO activation between them, so they collapse
    # host-side to a single 176->1 affine map; both pools' lane selections are
    # folded into that map (zeros at invalid columns).  The per-batch split is
    # a masked reduction, so the whole tail is VPU/XLU — no final MXU pass.
    g = jnp.maximum(full[:, 0:41], full[:, 2:43])                          # (32, 41)
    p = g * w_ref[:, _VF:_VF + 41]
    rowsum = jnp.sum(p, axis=1, keepdims=True)                             # (32, 1)
    z_all = jnp.sum(rowsum, keepdims=True)                                 # (1, 1)
    z0 = jnp.sum(rowsum * w_ref[:, _MSK:_MSK + 1], keepdims=True)          # batch 0
    z1 = z_all - z0                                                        # batch 1
    lane = lax.broadcasted_iota(jnp.int32, (1, B), 1)
    zb = jnp.where(lane == 0, z0, z1) + w_ref[0:1, _BE:_BE + B]            # (1, B)
    out_ref[0] = 1.0 / (1.0 + jnp.exp(-zb))


# ------------------------- parameters / host packing ------------------------ #

def init_params(key):
    ks = jax.random.split(key, 12)

    def u(k, shape, fan_in):
        bnd = 1.0 / np.sqrt(fan_in)
        return jax.random.uniform(k, shape, jnp.float32, -bnd, bnd)

    p = {}
    p["w1"], p["b1"] = u(ks[0], (16, 1, 3), 3),   u(ks[1], (16,), 3)
    p["w2"], p["b2"] = u(ks[2], (16, 16, 2), 32), u(ks[3], (16,), 32)
    p["w3"], p["b3"] = u(ks[4], (16, 16, 2), 32), u(ks[5], (16,), 32)
    p["w4"], p["b4"] = u(ks[6], (16, 16, 2), 32), u(ks[7], (16,), 32)
    p["wl1"], p["bl1"] = u(ks[8], (128, 176), 176), u(ks[9], (128,), 176)
    p["wl2"], p["bl2"] = u(ks[10], (1, 128), 128),  u(ks[11], (1,), 128)
    return p


def prepare_params(p):
    """One-time host-side packing of every constant operand into ONE slab.
    NOTE: B=2 is baked into the packing; changing B requires re-running this."""
    eye = np.eye(B, dtype=np.float32)

    def tap(w, k):
        # kron(W_k, I_B): rows/cols ordered (channel, batch), batch fastest.
        return np.kron(np.asarray(w, np.float32)[:, :, k], eye)

    def bias_col(b):
        return np.repeat(np.asarray(b, np.float32), B).reshape(B * C, 1)

    slab = np.zeros((B * C, _NCOL), np.float32)
    slab[:, _W1A:_W1A + B] = tap(p["w1"], 0)
    slab[:, _W1B:_W1B + B] = tap(p["w1"], 1)
    slab[:, _W1C:_W1C + B] = tap(p["w1"], 2)
    slab[:, _W2A:_W2A + B * C] = tap(p["w2"], 0)
    slab[:, _W2B:_W2B + B * C] = tap(p["w2"], 1)
    slab[:, _W3A:_W3A + B * C] = tap(p["w3"], 0)
    slab[:, _W3B:_W3B + B * C] = tap(p["w3"], 1)
    slab[:, _W4A:_W4A + B * C] = tap(p["w4"], 0)
    slab[:, _W4B:_W4B + B * C] = tap(p["w4"], 1)
    slab[:, _B1:_B1 + 1] = bias_col(p["b1"])
    slab[:, _B2:_B2 + 1] = bias_col(p["b2"])
    slab[:, _B3:_B3 + 1] = bias_col(p["b3"])
    slab[:, _B4:_B4 + 1] = bias_col(p["b4"])

    # Classifier collapse: Linear(176,128) -> Linear(128,1) with NO activation
    # between, so they fold exactly into one 176->1 affine map.
    wl1, bl1 = np.asarray(p["wl1"], np.float32), np.asarray(p["bl1"], np.float32)
    wl2, bl2 = np.asarray(p["wl2"], np.float32), np.asarray(p["bl2"], np.float32)
    weff = (wl2 @ wl1).reshape(C, 11)
    beff = float((wl2 @ bl1 + bl2)[0])
    # Both MaxPools stay implicit in-kernel, so valid flattened values sit at
    # columns 0,4,...,40 of the (32,41) pre-classifier activation.
    V = np.zeros((C, 41), np.float32)
    V[:, 0::4] = weff
    slab[:, _VF:_VF + 41] = np.repeat(V, B, axis=0)
    slab[:, _BE:_BE + B] = beff
    slab[:, _MSK] = (np.arange(B * C) % B == 0).astype(np.float32)  # batch-0 rows
    return {"slab": jnp.asarray(slab)}


# --------------------------------- wrapper ---------------------------------- #

@jax.jit
def professor_x_forward(x, noise, prep):
    """Batched ProfessorXModel forward.

    x, noise: (G, B, 1, 50) float32 — G independent invocations of the PyTorch
    forward (torch NCL), each with its own torch.std over its (B,1,50) input.
    `noise` must hold (2*rand - 1) uniform samples (torch.rand contract).
    A single (B, 1, 50) input is also accepted.
    Returns (G, B) (or (B,) for a single input): torch.squeeze of each result.
    """
    single = x.ndim == 3
    if single:
        x, noise = x[None], noise[None]
    G = x.shape[0]
    xs = x.reshape(G, B, L_IN)
    ns = noise.reshape(G, B, L_IN)
    res = pl.pallas_call(
        fused_kernel,
        out_shape=jax.ShapeDtypeStruct((G, 1, B), jnp.float32),
        grid_spec=pltpu.PrefetchScalarGridSpec(
            num_scalar_prefetch=0,
            grid=(G,),
            in_specs=[
                pl.BlockSpec((1, B, L_IN), lambda g: (g, 0, 0)),
                pl.BlockSpec((1, B, L_IN), lambda g: (g, 0, 0)),
                # constant block index: slab is DMA'd once and stays resident
                pl.BlockSpec((B * C, _NCOL), lambda g: (0, 0)),
            ],
            out_specs=pl.BlockSpec((1, 1, B), lambda g: (g, 0, 0)),
        ),
        compiler_params=pltpu.CompilerParams(
            dimension_semantics=("parallel",),   # shard forwards over v7x's 2 TCs
        ),
    )(xs, ns, prep["slab"])
    out = res.reshape(G, B)
    return out[0] if single else out


# ------------------------------ pure-JAX reference -------------------------- #

def reference_forward(x, noise, p):
    """x, noise: (G, B, 1, 50). Returns (G, B)."""
    def conv1d(h, w, b):
        k = w.shape[2]
        l_out = h.shape[2] - k + 1
        out = jnp.zeros((h.shape[0], w.shape[0], l_out), jnp.float32)
        for i in range(k):
            out = out + jnp.einsum('oc,bcl->bol', w[:, :, i], h[:, :, i:i + l_out])
        return out + b[None, :, None]

    def one(xg, ng):
        std = jnp.std(xg, ddof=1)
        h = xg + ng * 2.0 * std                                  # snr = 1.0
        h = jax.nn.relu(conv1d(h, p["w1"], p["b1"]))
        h = jax.nn.relu(conv1d(h, p["w2"], p["b2"]))
        h = jax.nn.relu(conv1d(h, p["w3"], p["b3"]))
        h = jnp.maximum(h[:, :, 0::2], h[:, :, 1::2])
        h = jax.nn.relu(conv1d(h, p["w4"], p["b4"]))
        h = jnp.maximum(h[:, :, 0::2], h[:, :, 1::2])
        flat = h.reshape(h.shape[0], -1)
        z = flat @ p["wl1"].T + p["bl1"]
        z = z @ p["wl2"].T + p["bl2"]
        return jnp.squeeze(jax.nn.sigmoid(z))

    return jnp.stack([one(x[g], noise[g]) for g in range(x.shape[0])])


if __name__ == "__main__":
    params = init_params(jax.random.PRNGKey(42))
    prep = prepare_params(params)            # hoisted: built once, reused every call

    G = 8                                    # 8 independent forwards, ONE pallas_call
    key = jax.random.PRNGKey(0)
    kx, kn = jax.random.split(key)
    x = jax.random.normal(kx, (G, B, 1, L_IN), jnp.float32)
    # torch.rand replacement: deterministic JAX uniform, supplied as (2*rand - 1)
    noise = 2.0 * jax.random.uniform(kn, (G, B, 1, L_IN), jnp.float32) - 1.0

    out = jax.block_until_ready(professor_x_forward(x, noise, prep))

    ref = reference_forward(x, noise, params)
    assert out.shape == (G, B)
    np.testing.assert_allclose(np.asarray(out), np.asarray(ref), atol=1e-3, rtol=1e-4)

    print("KERNEL_OK")
</pallas_src>

<mosaic_0001>
module attributes {stable_mosaic.version = 11 : i64} {
  func.func @fused_kernel(%arg0: i32, %arg1: memref<1x2x50xf32, #tpu.memory_space<vmem>>, %arg2: memref<1x2x50xf32, #tpu.memory_space<vmem>>, %arg3: memref<32x1024xf32, #tpu.memory_space<vmem>>, %arg4: memref<1x1x2xf32, #tpu.memory_space<vmem>>) attributes {dimension_semantics = [#tpu.dimension_semantics<parallel>], iteration_bounds = array<i64: 8>, scalar_prefetch = 0 : i64, scratch_operands = 0 : i64, tpu.core_type = #tpu.core_type<tc>, window_params = [{transform_indices = @transform_0, window_bounds = array<i64: 1, 2, 50>}, {transform_indices = @transform_1, window_bounds = array<i64: 1, 2, 50>}, {pipeline_mode = #tpu.pipeline_mode<synchronous>, transform_indices = @transform_2, window_bounds = array<i64: 32, 1024>}, {transform_indices = @transform_3, window_bounds = array<i64: 1, 1, 2>}]} {
    %c0 = arith.constant 0 : index
    %c0_0 = arith.constant 0 : index
    %c0_1 = arith.constant 0 : index
    %0 = vector.load %arg1[%c0, %c0_0, %c0_1] : memref<1x2x50xf32, #tpu.memory_space<vmem>>, vector<1x2x50xf32>
    %1 = vector.shape_cast %0 : vector<1x2x50xf32> to vector<2x50xf32>
    %c0_2 = arith.constant 0 : index
    %c0_3 = arith.constant 0 : index
    %c0_4 = arith.constant 0 : index
    %2 = vector.load %arg2[%c0_2, %c0_3, %c0_4] : memref<1x2x50xf32, #tpu.memory_space<vmem>>, vector<1x2x50xf32>
    %3 = vector.shape_cast %2 : vector<1x2x50xf32> to vector<2x50xf32>
    %c0_5 = arith.constant 0 : index
    %c0_6 = arith.constant 0 : index
    %4 = vector.load %arg3[%c0_5, %c0_6] : memref<32x1024xf32, #tpu.memory_space<vmem>>, vector<32x2xf32>
    %5 = vector.extract_strided_slice %1 {offsets = [0, 0], sizes = [2, 48], strides = [1, 1]} : vector<2x50xf32> to vector<2x48xf32>
    %cst = arith.constant dense<0.000000e+00> : vector<32x48xf32>
    %6 = tpu.matmul %4, %5, %cst {dimension_numbers = #tpu.dot_dimension_numbers<[1], [0], [0], [1], [0, 0, 1, 1], [], []>} : vector<32x2xf32>, vector<2x48xf32>, vector<32x48xf32> -> vector<32x48xf32>
    %c0_7 = arith.constant 0 : index
    %c8 = arith.constant 8 : index
    %7 = vector.load %arg3[%c0_7, %c8] : memref<32x1024xf32, #tpu.memory_space<vmem>>, vector<32x2xf32>
    %8 = vector.extract_strided_slice %1 {offsets = [0, 1], sizes = [2, 48], strides = [1, 1]} : vector<2x50xf32> to vector<2x48xf32>
    %cst_8 = arith.constant dense<0.000000e+00> : vector<32x48xf32>
    %9 = tpu.matmul %7, %8, %cst_8 {dimension_numbers = #tpu.dot_dimension_numbers<[1], [0], [0], [1], [0, 0, 1, 1], [], []>} : vector<32x2xf32>, vector<2x48xf32>, vector<32x48xf32> -> vector<32x48xf32>
    %10 = arith.addf %6, %9 : vector<32x48xf32>
    %c0_9 = arith.constant 0 : index
    %c16 = arith.constant 16 : index
    %11 = vector.load %arg3[%c0_9, %c16] : memref<32x1024xf32, #tpu.memory_space<vmem>>, vector<32x2xf32>
    %12 = vector.extract_strided_slice %1 {offsets = [0, 2], sizes = [2, 48], strides = [1, 1]} : vector<2x50xf32> to vector<2x48xf32>
    %cst_10 = arith.constant dense<0.000000e+00> : vector<32x48xf32>
    %13 = tpu.matmul %11, %12, %cst_10 {dimension_numbers = #tpu.dot_dimension_numbers<[1], [0], [0], [1], [0, 0, 1, 1], [], []>} : vector<32x2xf32>, vector<2x48xf32>, vector<32x48xf32> -> vector<32x48xf32>
    %14 = arith.addf %10, %13 : vector<32x48xf32>
    %c0_11 = arith.constant 0 : index
    %c0_12 = arith.constant 0 : index
    %15 = vector.load %arg3[%c0_11, %c0_12] : memref<32x1024xf32, #tpu.memory_space<vmem>>, vector<32x2xf32>
    %16 = vector.extract_strided_slice %3 {offsets = [0, 0], sizes = [2, 48], strides = [1, 1]} : vector<2x50xf32> to vector<2x48xf32>
    %cst_13 = arith.constant dense<0.000000e+00> : vector<32x48xf32>
    %17 = tpu.matmul %15, %16, %cst_13 {dimension_numbers = #tpu.dot_dimension_numbers<[1], [0], [0], [1], [0, 0, 1, 1], [], []>} : vector<32x2xf32>, vector<2x48xf32>, vector<32x48xf32> -> vector<32x48xf32>
    %c0_14 = arith.constant 0 : index
    %c8_15 = arith.constant 8 : index
    %18 = vector.load %arg3[%c0_14, %c8_15] : memref<32x1024xf32, #tpu.memory_space<vmem>>, vector<32x2xf32>
    %19 = vector.extract_strided_slice %3 {offsets = [0, 1], sizes = [2, 48], strides = [1, 1]} : vector<2x50xf32> to vector<2x48xf32>
    %cst_16 = arith.constant dense<0.000000e+00> : vector<32x48xf32>
    %20 = tpu.matmul %18, %19, %cst_16 {dimension_numbers = #tpu.dot_dimension_numbers<[1], [0], [0], [1], [0, 0, 1, 1], [], []>} : vector<32x2xf32>, vector<2x48xf32>, vector<32x48xf32> -> vector<32x48xf32>
    %21 = arith.addf %17, %20 : vector<32x48xf32>
    %c0_17 = arith.constant 0 : index
    %c16_18 = arith.constant 16 : index
    %22 = vector.load %arg3[%c0_17, %c16_18] : memref<32x1024xf32, #tpu.memory_space<vmem>>, vector<32x2xf32>
    %23 = vector.extract_strided_slice %3 {offsets = [0, 2], sizes = [2, 48], strides = [1, 1]} : vector<2x50xf32> to vector<2x48xf32>
    %cst_19 = arith.constant dense<0.000000e+00> : vector<32x48xf32>
    %24 = tpu.matmul %22, %23, %cst_19 {dimension_numbers = #tpu.dot_dimension_numbers<[1], [0], [0], [1], [0, 0, 1, 1], [], []>} : vector<32x2xf32>, vector<2x48xf32>, vector<32x48xf32> -> vector<32x48xf32>
    %25 = arith.addf %21, %24 : vector<32x48xf32>
    %26 = vector.shape_cast %1 : vector<2x50xf32> to vector<1x2x50xf32>
    %cst_20 = arith.constant dense<0.000000e+00> : vector<1xf32>
    %27 = vector.multi_reduction <add>, %26, %cst_20 [1, 2] : vector<1x2x50xf32> to vector<1xf32>
    %28 = vector.shape_cast %27 : vector<1xf32> to vector<1x1x1xf32>
    %29 = vector.extract %28[0, 0, 0] : f32 from vector<1x1x1xf32>
    %30 = vector.broadcast %29 : f32 to vector<1x1xf32>
    %cst_21 = arith.constant 1.000000e+02 : f32
    %31 = vector.broadcast %cst_21 : f32 to vector<1x1xf32>
    %32 = arith.divf %30, %31 : vector<1x1xf32>
    %33 = vector.broadcast %32 : vector<1x1xf32> to vector<2x50xf32>
    %34 = arith.subf %1, %33 : vector<2x50xf32>
    %35 = arith.mulf %34, %34 : vector<2x50xf32>
    %36 = vector.shape_cast %35 : vector<2x50xf32> to vector<1x2x50xf32>
    %cst_22 = arith.constant dense<0.000000e+00> : vector<1xf32>
    %37 = vector.multi_reduction <add>, %36, %cst_22 [1, 2] : vector<1x2x50xf32> to vector<1xf32>
    %38 = vector.shape_cast %37 : vector<1xf32> to vector<1x1x1xf32>
    %39 = vector.extract %38[0, 0, 0] : f32 from vector<1x1x1xf32>
    %40 = vector.broadcast %39 : f32 to vector<1x1xf32>
    %cst_23 = arith.constant 9.900000e+01 : f32
    %41 = vector.broadcast %cst_23 : f32 to vector<1x1xf32>
    %42 = arith.divf %40, %41 : vector<1x1xf32>
    %43 = math.sqrt %42 : vector<1x1xf32>
    %cst_24 = arith.constant 2.000000e+00 : f32
    %44 = vector.broadcast %cst_24 : f32 to vector<1x1xf32>
    %45 = arith.mulf %44, %43 : vector<1x1xf32>
    %46 = vector.broadcast %45 : vector<1x1xf32> to vector<32x48xf32>
    %47 = arith.mulf %46, %25 : vector<32x48xf32>
    %48 = arith.addf %14, %47 : vector<32x48xf32>
    %c0_25 = arith.constant 0 : index
    %c24 = arith.constant 24 : index
    %49 = vector.load %arg3[%c0_25, %c24] : memref<32x1024xf32, #tpu.memory_space<vmem>>, vector<32x1xf32>
    %50 = vector.broadcast %49 : vector<32x1xf32> to vector<32x48xf32>
    %51 = arith.addf %48, %50 : vector<32x48xf32>
    %cst_26 = arith.constant 0.000000e+00 : f32
    %52 = vector.broadcast %cst_26 : f32 to vector<32x48xf32>
    %53 = arith.maximumf %51, %52 : vector<32x48xf32>
    %c0_27 = arith.constant 0 : index
    %c128 = arith.constant 128 : index
    %54 = vector.load %arg3[%c0_27, %c128] : memref<32x1024xf32, #tpu.memory_space<vmem>>, vector<32x32xf32>
    %55 = vector.extract_strided_slice %53 {offsets = [0, 0], sizes = [32, 47], strides = [1, 1]} : vector<32x48xf32> to vector<32x47xf32>
    %cst_28 = arith.constant dense<0.000000e+00> : vector<32x47xf32>
    %56 = tpu.matmul %54, %55, %cst_28 {dimension_numbers = #tpu.dot_dimension_numbers<[1], [0], [0], [1], [0, 0, 1, 1], [], []>} : vector<32x32xf32>, vector<32x47xf32>, vector<32x47xf32> -> vector<32x47xf32>
    %c0_29 = arith.constant 0 : index
    %c256 = arith.constant 256 : index
    %57 = vector.load %arg3[%c0_29, %c256] : memref<32x1024xf32, #tpu.memory_space<vmem>>, vector<32x32xf32>
    %58 = vector.extract_strided_slice %53 {offsets = [0, 1], sizes = [32, 47], strides = [1, 1]} : vector<32x48xf32> to vector<32x47xf32>
    %cst_30 = arith.constant dense<0.000000e+00> : vector<32x47xf32>
    %59 = tpu.matmul %57, %58, %cst_30 {dimension_numbers = #tpu.dot_dimension_numbers<[1], [0], [0], [1], [0, 0, 1, 1], [], []>} : vector<32x32xf32>, vector<32x47xf32>, vector<32x47xf32> -> vector<32x47xf32>
    %60 = arith.addf %56, %59 : vector<32x47xf32>
    %c0_31 = arith.constant 0 : index
    %c25 = arith.constant 25 : index
    %61 = vector.load %arg3[%c0_31, %c25] : memref<32x1024xf32, #tpu.memory_space<vmem>>, vector<32x1xf32>
    %62 = vector.broadcast %61 : vector<32x1xf32> to vector<32x47xf32>
    %63 = arith.addf %60, %62 : vector<32x47xf32>
    %cst_32 = arith.constant 0.000000e+00 : f32
    %64 = vector.broadcast %cst_32 : f32 to vector<32x47xf32>
    %65 = arith.maximumf %63, %64 : vector<32x47xf32>
    %c0_33 = arith.constant 0 : index
    %c384 = arith.constant 384 : index
    %66 = vector.load %arg3[%c0_33, %c384] : memref<32x1024xf32, #tpu.memory_space<vmem>>, vector<32x32xf32>
    %67 = vector.extract_strided_slice %65 {offsets = [0, 0], sizes = [32, 46], strides = [1, 1]} : vector<32x47xf32> to vector<32x46xf32>
    %cst_34 = arith.constant dense<0.000000e+00> : vector<32x46xf32>
    %68 = tpu.matmul %66, %67, %cst_34 {dimension_numbers = #tpu.dot_dimension_numbers<[1], [0], [0], [1], [0, 0, 1, 1], [], []>} : vector<32x32xf32>, vector<32x46xf32>, vector<32x46xf32> -> vector<32x46xf32>
    %c0_35 = arith.constant 0 : index
    %c512 = arith.constant 512 : index
    %69 = vector.load %arg3[%c0_35, %c512] : memref<32x1024xf32, #tpu.memory_space<vmem>>, vector<32x32xf32>
    %70 = vector.extract_strided_slice %65 {offsets = [0, 1], sizes = [32, 46], strides = [1, 1]} : vector<32x47xf32> to vector<32x46xf32>
    %cst_36 = arith.constant dense<0.000000e+00> : vector<32x46xf32>
    %71 = tpu.matmul %69, %70, %cst_36 {dimension_numbers = #tpu.dot_dimension_numbers<[1], [0], [0], [1], [0, 0, 1, 1], [], []>} : vector<32x32xf32>, vector<32x46xf32>, vector<32x46xf32> -> vector<32x46xf32>
    %72 = arith.addf %68, %71 : vector<32x46xf32>
    %c0_37 = arith.constant 0 : index
    %c26 = arith.constant 26 : index
    %73 = vector.load %arg3[%c0_37, %c26] : memref<32x1024xf32, #tpu.memory_space<vmem>>, vector<32x1xf32>
    %74 = vector.broadcast %73 : vector<32x1xf32> to vector<32x46xf32>
    %75 = arith.addf %72, %74 : vector<32x46xf32>
    %cst_38 = arith.constant 0.000000e+00 : f32
    %76 = vector.broadcast %cst_38 : f32 to vector<32x46xf32>
    %77 = arith.maximumf %75, %76 : vector<32x46xf32>
    %78 = vector.extract_strided_slice %77 {offsets = [0, 0], sizes = [32, 45], strides = [1, 1]} : vector<32x46xf32> to vector<32x45xf32>
    %79 = vector.extract_strided_slice %77 {offsets = [0, 1], sizes = [32, 45], strides = [1, 1]} : vector<32x46xf32> to vector<32x45xf32>
    %80 = arith.maximumf %78, %79 : vector<32x45xf32>
    %c0_39 = arith.constant 0 : index
    %c640 = arith.constant 640 : index
    %81 = vector.load %arg3[%c0_39, %c640] : memref<32x1024xf32, #tpu.memory_space<vmem>>, vector<32x32xf32>
    %82 = vector.extract_strided_slice %80 {offsets = [0, 0], sizes = [32, 43], strides = [1, 1]} : vector<32x45xf32> to vector<32x43xf32>
    %cst_40 = arith.constant dense<0.000000e+00> : vector<32x43xf32>
    %83 = tpu.matmul %81, %82, %cst_40 {dimension_numbers = #tpu.dot_dimension_numbers<[1], [0], [0], [1], [0, 0, 1, 1], [], []>} : vector<32x32xf32>, vector<32x43xf32>, vector<32x43xf32> -> vector<32x43xf32>
    %c0_41 = arith.constant 0 : index
    %c768 = arith.constant 768 : index
    %84 = vector.load %arg3[%c0_41, %c768] : memref<32x1024xf32, #tpu.memory_space<vmem>>, vector<32x32xf32>
    %85 = vector.extract_strided_slice %80 {offsets = [0, 2], sizes = [32, 43], strides = [1, 1]} : vector<32x45xf32> to vector<32x43xf32>
    %cst_42 = arith.constant dense<0.000000e+00> : vector<32x43xf32>
    %86 = tpu.matmul %84, %85, %cst_42 {dimension_numbers = #tpu.dot_dimension_numbers<[1], [0], [0], [1], [0, 0, 1, 1], [], []>} : vector<32x32xf32>, vector<32x43xf32>, vector<32x43xf32> -> vector<32x43xf32>
    %87 = arith.addf %83, %86 : vector<32x43xf32>
    %c0_43 = arith.constant 0 : index
    %c27 = arith.constant 27 : index
    %88 = vector.load %arg3[%c0_43, %c27] : memref<32x1024xf32, #tpu.memory_space<vmem>>, vector<32x1xf32>
    %89 = vector.broadcast %88 : vector<32x1xf32> to vector<32x43xf32>
    %90 = arith.addf %87, %89 : vector<32x43xf32>
    %cst_44 = arith.constant 0.000000e+00 : f32
    %91 = vector.broadcast %cst_44 : f32 to vector<32x43xf32>
    %92 = arith.maximumf %90, %91 : vector<32x43xf32>
    %93 = vector.extract_strided_slice %92 {offsets = [0, 0], sizes = [32, 41], strides = [1, 1]} : vector<32x43xf32> to vector<32x41xf32>
    %94 = vector.extract_strided_slice %92 {offsets = [0, 2], sizes = [32, 41], strides = [1, 1]} : vector<32x43xf32> to vector<32x41xf32>
    %95 = arith.maximumf %93, %94 : vector<32x41xf32>
    %c0_45 = arith.constant 0 : index
    %c896 = arith.constant 896 : index
    %96 = vector.load %arg3[%c0_45, %c896] : memref<32x1024xf32, #tpu.memory_space<vmem>>, vector<32x41xf32>
    %97 = arith.mulf %95, %96 : vector<32x41xf32>
    %cst_46 = arith.constant dense<0.000000e+00> : vector<32xf32>
    %98 = vector.multi_reduction <add>, %97, %cst_46 [1] : vector<32x41xf32> to vector<32xf32>
    %99 = vector.shape_cast %98 : vector<32xf32> to vector<32x1xf32>
    %100 = vector.shape_cast %99 : vector<32x1xf32> to vector<1x32x1xf32>
    %cst_47 = arith.constant dense<0.000000e+00> : vector<1xf32>
    %101 = vector.multi_reduction <add>, %100, %cst_47 [1, 2] : vector<1x32x1xf32> to vector<1xf32>
    %102 = vector.shape_cast %101 : vector<1xf32> to vector<1x1x1xf32>
    %103 = vector.extract %102[0, 0, 0] : f32 from vector<1x1x1xf32>
    %104 = vector.broadcast %103 : f32 to vector<1x1xf32>
    %c0_48 = arith.constant 0 : index
    %c40 = arith.constant 40 : index
    %105 = vector.load %arg3[%c0_48, %c40] : memref<32x1024xf32, #tpu.memory_space<vmem>>, vector<32x1xf32>
    %106 = arith.mulf %99, %105 : vector<32x1xf32>
    %107 = vector.shape_cast %106 : vector<32x1xf32> to vector<1x32x1xf32>
    %cst_49 = arith.constant dense<0.000000e+00> : vector<1xf32>
    %108 = vector.multi_reduction <add>, %107, %cst_49 [1, 2] : vector<1x32x1xf32> to vector<1xf32>
    %109 = vector.shape_cast %108 : vector<1xf32> to vector<1x1x1xf32>
    %110 = vector.extract %109[0, 0, 0] : f32 from vector<1x1x1xf32>
    %111 = vector.broadcast %110 : f32 to vector<1x1xf32>
    %112 = arith.subf %104, %111 : vector<1x1xf32>
    %113 = tpu.iota {dimensions = array<i32: 1>} : vector<1x2xi32>
    %c0_i32 = arith.constant 0 : i32
    %114 = vector.broadcast %c0_i32 : i32 to vector<1x2xi32>
    %115 = arith.cmpi eq, %113, %114 : vector<1x2xi32>
    %116 = vector.shape_cast %111 : vector<1x1xf32> to vector<1x1xf32>
    %117 = vector.broadcast %116 : vector<1x1xf32> to vector<1x2xf32>
    %118 = vector.shape_cast %112 : vector<1x1xf32> to vector<1x1xf32>
    %119 = vector.broadcast %118 : vector<1x1xf32> to vector<1x2xf32>
    %120 = arith.select %115, %117, %119 : vector<1x2xi1>, vector<1x2xf32>
    %c0_50 = arith.constant 0 : index
    %c32 = arith.constant 32 : index
    %121 = vector.load %arg3[%c0_50, %c32] : memref<32x1024xf32, #tpu.memory_space<vmem>>, vector<1x2xf32>
    %122 = arith.addf %120, %121 : vector<1x2xf32>
    %cst_51 = arith.constant 0.000000e+00 : f32
    %123 = vector.broadcast %cst_51 : f32 to vector<1x2xf32>
    %124 = arith.subf %123, %122 : vector<1x2xf32>
    %125 = math.exp %124 : vector<1x2xf32>
    %cst_52 = arith.constant 1.000000e+00 : f32
    %126 = vector.broadcast %cst_52 : f32 to vector<1x2xf32>
    %127 = arith.addf %126, %125 : vector<1x2xf32>
    %cst_53 = arith.constant 1.000000e+00 : f32
    %128 = vector.broadcast %cst_53 : f32 to vector<1x2xf32>
    %129 = arith.divf %128, %127 : vector<1x2xf32>
    %c0_54 = arith.constant 0 : index
    %c0_55 = arith.constant 0 : index
    %c0_56 = arith.constant 0 : index
    %130 = vector.load %arg4[%c0_54, %c0_55, %c0_56] : memref<1x1x2xf32, #tpu.memory_space<vmem>>, vector<1x1x2xf32>
    %131 = vector.shape_cast %130 : vector<1x1x2xf32> to vector<1x2xf32>
    %132 = vector.shape_cast %129 : vector<1x2xf32> to vector<1x1x2xf32>
    tpu.vector_store %arg4[%c0_54, %c0_55, %c0_56], %132 {strides = array<i32>} : memref<1x1x2xf32, #tpu.memory_space<vmem>>, vector<1x1x2xf32>,
    return
  }
  func.func @transform_0(%arg0: i32) -> (i32, i32, i32) {
    %c0_i32 = arith.constant 0 : i32
    %c0_i32_0 = arith.constant 0 : i32
    %c0_i32_1 = arith.constant 0 : i32
    return %arg0, %c0_i32, %c0_i32_0 : i32, i32, i32
  }
  func.func @transform_1(%arg0: i32) -> (i32, i32, i32) {
    %c0_i32 = arith.constant 0 : i32
    %c0_i32_0 = arith.constant 0 : i32
    %c0_i32_1 = arith.constant 0 : i32
    return %arg0, %c0_i32, %c0_i32_0 : i32, i32, i32
  }
  func.func @transform_2(%arg0: i32) -> (i32, i32) {
    %c0_i32 = arith.constant 0 : i32
    %c0_i32_0 = arith.constant 0 : i32
    %c0_i32_1 = arith.constant 0 : i32
    return %c0_i32, %c0_i32_0 : i32, i32
  }
  func.func @transform_3(%arg0: i32) -> (i32, i32, i32) {
    %c0_i32 = arith.constant 0 : i32
    %c0_i32_0 = arith.constant 0 : i32
    %c0_i32_1 = arith.constant 0 : i32
    return %arg0, %c0_i32, %c0_i32_0 : i32, i32, i32
  }
}

</mosaic_0001>

<bundles_post_ra>
// kernel: professor_x_forward.1
= control target key start
LH: loop header
LB: loop body
LE: loop exit
PB: predicated region body
PF: predicated region fallthrough
CT: control target
= control target key end

     0   :  { %8 = vsyncpa [#allocation3], 0  ;;  %s2814_s0 = inlined_call_operand.hbm [shape: f32[8,2,50], index: 0, kind: input, shape index: {}]   ;;  %s2815_s1 = inlined_call_operand.hbm [shape: f32[8,2,50], index: 1, kind: input, shape index: {}]   ;;  %s2816_s2 = inlined_call_operand.hbm [shape: f32[32,1024], index: 2, kind: input, shape index: {}]   ;;  %s2817_s3 = inlined_call_operand.vmem [shape: f32[8,1,2], index: 3, kind: output, shape index: {}]  }
   0x1   :  { %10 = vsyncpa [#allocation3 + $0x1], 0 }
   0x2   :  { %11 = vsyncpa [#allocation5], 0 }
   0x3   :  { %13 = vsyncpa [#allocation5 + $0x1], 0  ;;  %s2497_s12 = smov 0   ;;  %s2499_s13 = smov 0  }
   0x4   :  { %s2501_s14 = smov 0   ;;  %s2503_s15 = smov 0  }
   0x5 LB: > { %s2516_s16 = sadd.s32 4294967295, %s2460_s15   ;;  %p39_p0 = scmp.ne.s32.totalorder %s2452_s13, %s2448_s12  ;;  %s2460_s15 = sphi %s2503_s15, %s2832_s15   ;;  %s2456_s14 = sphi %s2501_s14, %s2831_s14   ;;  %s2452_s13 = sphi %s2499_s13, %s2830_s13   ;;  %s2448_s12 = sphi %s2497_s12, %s2829_s12  }
   0x6   : > { %p2818_p1 = scmp.eq.s32.totalorder %s2516_s16, 0  ;;  %p1850_p2 = scmp.ge.s32.totalorder %s2460_s15, 1 }
   0x7   : > { %p123_p3 = scmp.lt.s32.totalorder %s2460_s15, 9  ;;  %s2462_s19 = smov [#allocation6]  }
   0x8   : > { %p2524_p4 = por %p2818_p1, %p39_p0  ;;  %s135_s20 = sshll.u32 %s2462_s19, 4  ;;  %s136_s20 = int_to_ptr.vmem [resolvable:$true] %s135_s20 }
   0x9   : > { %p2528_p5 = pnand %p1850_p2, %p123_p3  ;;  %s2541_s22 = sadd.s32 1, %s2460_s15  }
   0xa   : > { %s2821_s17 = scalar_select %p2524_p4, 1, 0 }
   0xb   : > { %s2822_s18 = scalar_select %p2528_p5, 1, 0 }
   0xc   : > { %p2219_p6 = pneg %p2528_p5  ;;  %s26_s23 = sadd.s32 1, %s2456_s14 }
   0xd   : > { %s23_s24 = ssub.s32 %s2460_s15, %s2541_s22  ;;  %s2330_s27 = scalar_lea.hbm %s2816_s2, 4096 }
   0xe   : > { %p2536_p7 = pnand %p2219_p6, %p2818_p1  ;;  %p2331_p8 = scmp.ne.s32.totalorder %s2816_s2, %s2330_s27 }
   0xf   : > { %p2337_p12 = scmp.lt.u32.totalorder %s2330_s27, %s2816_s2 }
  0x10   : > { %p2332_p9 = pneg %p2536_p7 }
  0x12   : > { %p2333_p10 = pnand %p2332_p9, %p2331_p8 }
  0x14   : > { %p2334_p11 = pneg %p2333_p10 }
  0x16   : > { %p2339_p13 = pnand %p2337_p12, %p2334_p11 }
  0x18   : > { %2342 = shalt.err (!%p2339_p13)
}
  0x19   : > { %s2343_s5 = scalar_lea.vmem %s136_s20, 4096  ;;  %p2351_p6 = scmp.lt.s32.totalorder %s136_s20, %s136_s20 }
  0x1a   : > { %p2344_p0 = scmp.ne.s32.totalorder %s136_s20, %s2343_s5  ;;  %p2352_p1 = scmp.lt.s32.totalorder %s2343_s5, %s2343_s5 }
  0x1c   : > { %p2346_p2 = pnand %p2344_p0, %p2332_p9  ;;  %p2353_p4 = por %p2352_p1, %p2351_p6 }
  0x1e   : > { %p2347_p3 = pneg %p2346_p2 }
  0x20   : > { %p2354_p5 = pnand %p2353_p4, %p2347_p3 }
  0x22   : > { %2357 = shalt.err (!%p2354_p5)
}
  0x23   : > { %s2463_s6 = smov 1024   ;;  %s2464_s7 = smov 64  }
  0x24   : > { %2222 = dma.hbm_to_vmem [thread:$0]  (!%p2536_p7), %s2816_s2, 4096, %s136_s20, [#allocation5], %s2463_s6, %s2463_s6, %s2464_s7  }
  0x25   : > { %p24_p8 = scmp.eq.s32.totalorder %s23_s24, 0  ;;  %p33_p1 = scmp.ne.s32.totalorder %s2456_s14, %s2452_s13 }
  0x26   : > { %p34_p4 = scmp.eq.s32.totalorder %s2460_s15, 0  ;;  %p2231_p5 = scmp.lt.s32.totalorder %s2460_s15, 8 }
  0x27   : > { %s2567_s10 = scalar_select %p24_p8, %s2456_s14, %s26_s23  }
  0x28   : > { %p35_p9 = por %p34_p4, %p33_p1  ;;  %s149_s11 = sand.u32 1, %s2456_s14  }
  0x29   : > { %s2570_s12 = sshll.u32 %s149_s11, 1  ;;  %s1854_s19 = sshll.u32 %s2460_s15, 5 }
  0x2a   : > { %s2576_s21 = scalar_lea.hbm %s2814_s0, %s1854_s19  ;;  %s153_s20 = scalar_lea.vmem [#allocation2], %s2570_s12 }
  0x2b   : > { %s160_s24 = sshll.u32 %s153_s20, 4  ;;  %p2581_p7 = pnand %p2231_p5, %p35_p9  ;;  %s2579_s24 = int_to_ptr.vmem [resolvable:$true] %s160_s24 }
  0x2c   : > { %s2588_s29 = scalar_lea.hbm %s2815_s1, %s1854_s19  ;;  %s167_s30 = sand.u32 1, %s2460_s15  }
  0x2d   : > { %s150_s4 = scalar_lea.sflag [#allocation3], %s149_s11  ;;  %s2358_s5 = scalar_lea.hbm %s2576_s21, 32 }
  0x2e   : > { %p2359_p10 = scmp.ne.s32.totalorder %s2576_s21, %s2358_s5  ;;  %p2360_p11 = pneg %p2581_p7 }
  0x2f   : > { %s2363_s8 = scalar_lea.hbm %s2814_s0, 256  ;;  %p2364_p0 = scmp.lt.u32.totalorder %s2576_s21, %s2814_s0 }
  0x30   : > { %p2361_p12 = pnand %p2360_p11, %p2359_p10  ;;  %p2365_p2 = scmp.lt.u32.totalorder %s2363_s8, %s2358_s5 }
  0x31   : > { %p2367_p6 = scmp.lt.u32.totalorder %s2358_s5, %s2576_s21 }
  0x32   : > { %p2362_p13 = pneg %p2361_p12  ;;  %p2366_p3 = por %p2365_p2, %p2364_p0 }
  0x34   : > { %p2368_p8 = por %p2367_p6, %p2366_p3 }
  0x36   : > { %p2369_p1 = pnand %p2368_p8, %p2362_p13 }
  0x38   : > { %2372 = shalt.err (!%p2369_p1)
}
  0x39   : > { %s2373_s11 = scalar_lea.vmem %s2579_s24, 32  ;;  %s2465_s19 = smov [#allocation2]  }
  0x3a   : > { %p2374_p4 = scmp.ne.s32.totalorder %s2579_s24, %s2373_s11  ;;  %s2378_s26 = sshll.u32 %s2465_s19, 4  ;;  %s2379_s26 = int_to_ptr.vmem [resolvable:$false] %s2378_s26 }
  0x3b   : > { %s2380_s20 = scalar_lea.vmem %s2379_s26, 64  ;;  %p2381_p10 = scmp.lt.s32.totalorder %s2579_s24, %s2379_s26 }
  0x3c   : > { %p2376_p5 = pnand %p2374_p4, %p2360_p11  ;;  %p2382_p12 = scmp.lt.s32.totalorder %s2380_s20, %s2373_s11 }
  0x3e   : > { %p2377_p9 = pneg %p2376_p5  ;;  %p2383_p0 = por %p2382_p12, %p2381_p10 }
  0x40   : > { %p2384_p2 = pnand %p2383_p0, %p2377_p9 }
  0x42   : > { %2387 = shalt.err (!%p2384_p2)
}
  0x43   : > { %2226 = dma.hbm_to_vmem [thread:$0]  (!%p2581_p7), %s2576_s21, 32, %s2579_s24, %s150_s4  }
  0x44   : > { %s171_s27 = scalar_lea.vmem [#allocation4], %s2570_s12  ;;  %s168_s5 = scalar_lea.sflag [#allocation5], %s167_s30 }
  0x45   : > { %s178_s28 = sshll.u32 %s171_s27, 4  ;;  %s2388_s6 = scalar_lea.hbm %s2588_s29, 32  ;;  %s179_s28 = int_to_ptr.vmem [resolvable:$true] %s178_s28 }
  0x46   : > { %p2389_p13 = scmp.ne.s32.totalorder %s2588_s29, %s2388_s6  ;;  %s2393_s9 = scalar_lea.hbm %s2815_s1, 256 }
  0x47   : > { %p2394_p8 = scmp.lt.u32.totalorder %s2588_s29, %s2815_s1  ;;  %p2395_p1 = scmp.lt.u32.totalorder %s2393_s9, %s2388_s6 }
  0x48   : > { %p2391_p3 = pnand %p2389_p13, %p2360_p11  ;;  %p2397_p5 = scmp.lt.u32.totalorder %s2388_s6, %s2588_s29 }
  0x49   : > { %p2396_p4 = por %p2395_p1, %p2394_p8 }
  0x4a   : > { %p2392_p6 = pneg %p2391_p3 }
  0x4b   : > { %p2398_p9 = por %p2397_p5, %p2396_p4 }
  0x4d   : > { %p2399_p10 = pnand %p2398_p9, %p2392_p6 }
  0x4f   : > { %2402 = shalt.err (!%p2399_p10)
}
  0x50   : > { %s2403_s15 = scalar_lea.vmem %s179_s28, 32  ;;  %s2466_s12 = smov [#allocation4]  }
  0x51   : > { %p2404_p12 = scmp.ne.s32.totalorder %s179_s28, %s2403_s15  ;;  %s2408_s21 = sshll.u32 %s2466_s12, 4  ;;  %s2409_s21 = int_to_ptr.vmem [resolvable:$false] %s2408_s21 }
  0x52   : > { %s2410_s24 = scalar_lea.vmem %s2409_s21, 64  ;;  %p2411_p13 = scmp.lt.s32.totalorder %s179_s28, %s2409_s21 }
  0x53   : > { %p2406_p0 = pnand %p2404_p12, %p2360_p11  ;;  %p2412_p3 = scmp.lt.s32.totalorder %s2410_s24, %s2403_s15 }
  0x55   : > { %p2407_p2 = pneg %p2406_p0  ;;  %p2413_p1 = por %p2412_p3, %p2411_p13 }
  0x57   : > { %p2414_p8 = pnand %p2413_p1, %p2407_p2 }
  0x59   : > { %2417 = shalt.err (!%p2414_p8)
}
  0x5a   : > { %2229 = dma.hbm_to_vmem [thread:$0]  (!%p2581_p7), %s2588_s29, 32, %s179_s28, %s168_s5  }
  0x5b   : > { %p2825_p6 = scmp.ne.s32.totalorder %s2822_s18, 0 }
  0x5c   : > { %s189_s30 = sand.u32 (!%p2825_p6), 1, %s2452_s13   ;;  %p2826_p11 = scmp.ne.s32.totalorder (!%p2825_p6), %s2821_s17, 0 }
  0x5d   : > { %187 = sbr.rel (%p2825_p6) target bundleno = 2363 (0x93b), region = 32  ;;  %s1858_s4 = sshll.u32 (!%p2825_p6), %s189_s30, 1 }
  0x5e   : > { %s190_s19 = scalar_lea.sflag (!%p2825_p6), [#allocation3], %s189_s30  ;;  %s193_s26 = scalar_lea.vmem (!%p2825_p6), [#allocation2], %s1858_s4 }
  0x64   : > { %2435 = dma.done.wait (%p2826_p11), %s190_s19, 32  }
  0x65   : > { %2437 = vsyncadd (%p2826_p11), %s190_s19, 4294967264  ;;  %s198_s20 = sand.u32 1, %s2516_s16   ;;  %s202_s27 = scalar_lea.vmem [#allocation4], %s1858_s4 }
  0x66   : > { %s199_s23 = scalar_lea.sflag [#allocation5], %s198_s20 }
  0x67   : > { %2439 = dma.done.wait (%p2826_p11), %s199_s23, 32  }
  0x68   : > { %2441 = vsyncadd (%p2826_p11), %s199_s23, 4294967264  ;;  %p2827_p7 = scmp.eq.s32.totalorder %s2516_s16, 0 }
  0x6a   : > { %2443 = dma.done.wait (%p2827_p7), [#allocation5], 4096   ;;  %p2828_p4 = pmov %p2827_p7 }
  0x6b   : > { %vm827_vm0 = vcmask 402432   ;;  %v2654_v0 = vld [vmem:[%s193_s26] sm:$0x3]  ;;  %s2467_s18 = smov 127   ;;  %v2660_v2 = vld [vmem:[#allocation6] sm:$0xff]  ;;  %s2468_s17 = smov 120  }
  0x6c   : > { %2445 = vsyncadd (%p2828_p4), [#allocation5], 4294963200  ;;  %v828_v1 = vsel %vm827_vm0, %v2654_v0, 0.0  ;;  %254 = vrot.lane.b32.xlu0 %v2654_v0, %s2467_s18  ;;  %v2663_v3 = vld [vmem:[#allocation6 + $0x80] sm:$0xff]  ;;  %v236_v5 = vld [vmem:[%s202_s27] sm:$0x3] }
  0x6d   : > { %829 = vadd.xlane.f32.xlu1 %v828_v1  ;;  %v2666_v4 = vld [vmem:[#allocation6 + $0xc0] sm:$0xff]  ;;  %s2469_s29 = smov 126   ;;  %s2470_s28 = smov 112   ;;  %vm265_vm1 = vcmask 1041408   ;;  %vm256_vm2 = vcmask 15360   ;;  %v2471_v7 = vmov 24  }
  0x6e   : > { %v2669_v6 = vld [vmem:[#allocation6 + $0x40] sm:$0xff]  ;;  %2003 = vmatprep.subr.msk.mxu0 %vm265_vm1, %v2654_v0  ;;  %2005 = vmatprep.mubr.msk.f32.mxu0 %vm256_vm2, %v2660_v2  ;;  %vm920_vm5 = vcmask 261120   ;;  %vm1671_vm6 = vcmask 334848   ;;  %s2475_s7 = smov 88   ;;  %vm1684_vm7 = vcmask 7168   ;;  %s2476_s8 = smov 96  }
  0x6f   : > { %2004 = vmatpush3.msk.msra.mxu0 %vm265_vm1, %v2654_v0  ;;  %2278 = vset.pattern.permute.xlu1 %v2471_v7  ;;  %p232_p5 = scmp.lt.s32.totalorder %s2516_s16, 7  ;;  %vm1756_vm9 = vcmask 8192  }
  0x70   : > { %245 = vrot.lane.b32.xlu0 %v2660_v2, %s2468_s17  ;;  %2006 = vmatmul.mubr.msk.f32.vlgmr.msra.gmra.mrb[0].mxu0 %vm256_vm2, %v2669_v6 }
  0x71   : > { %2008 = vmatprep.mubr.msk.f32.mxu0 %vm256_vm2, %v2663_v3  ;;  %s2834_s16 = smov (!%p232_p5, %s2516_s16), 7 }
  0x72   : > { %s234_s12 = scalar_lea.vmem %s2817_s3, %s2834_s16 }
  0x74   : > { %249 = vrot.lane.b32.xlu0 %v2663_v3, %s2468_s17  ;;  %2009 = vmatmul.mubr.msk.f32.gmra.mrb[2].mxu0 %vm256_vm2, %v2666_v4 }
  0x78   : > { %251 = vrot.lane.b32.xlu0 %v2666_v4, %s2468_s17 }
  0x7c   : > { %558 = vrot.lane.b32.xlu0 %v236_v5, %s2467_s18 }
  0x7e   : > { %247 = vrot.lane.b32.xlu1 %v2669_v6, %s2468_s17 }
  0x80   : > { %456 = vrot.lane.b32.xlu0 %v2654_v0, %s2469_s29 }
  0x82   : > { %734 = vrot.lane.b32.xlu1 %v236_v5, %s2469_s29 }
  0x84   : > { %448 = vrot.lane.b32.xlu0 %v2660_v2, %s2470_s28 }
  0x86   : > { %450 = vrot.lane.b32.xlu1 %v2669_v6, %s2470_s28 }
  0x88   : > { %452 = vrot.lane.b32.xlu0 %v2663_v3, %s2470_s28 }
  0x8a   : > { %454 = vrot.lane.b32.xlu1 %v2666_v4, %s2470_s28 }
  0x8e   : > { %873 = vperm.xlu1 %2278, %v2660_v2  }
  0x92   : > { %877 = vperm.xlu1 %2278, %v2669_v6  }
  0x96   : > { %881 = vperm.xlu1 %2278, %v2663_v3  }
  0x9a   : > { %885 = vperm.xlu1 %2278, %v2666_v4  }
  0xde   : > { %v255_v8 = vpop.permute.xlu0 %254 }
  0xdf   : > { %1995 = vmatprep.subr.msk.mxu1 %vm265_vm1, %v255_v8 }
  0xe0   : > { %1996 = vmatpush3.msk.msra.mxu1 %vm265_vm1, %v255_v8 }
  0xe2   : > { %v246_v9 = vpop.permute.xlu0 %245 }
  0xe3   : > { %1997 = vmatprep.mubr.msk.f32.mxu1 %vm256_vm2, %v246_v9 }
  0xe6   : > { %v250_v10 = vpop.permute.xlu0 %249 }
  0xea   : > { %v252_v11 = vpop.permute.xlu0 %251 }
  0xee   : > { %v559_v12 = vpop.permute.xlu0 %558 }
  0xef   : > { %2019 = vmatprep.subr.msk.mxu1 %vm265_vm1, %v559_v12 }
  0xf2   : > { %v457_v13 = vpop.permute.xlu0 %456 }
  0xf3   : > { %2011 = vmatprep.subr.msk.mxu0 %vm265_vm1, %v457_v13 }
  0xf4   : > { %2012 = vmatpush3.msk.msra.mxu0 %vm265_vm1, %v457_v13 }
  0xf6   : > { %v449_v14 = vpop.permute.xlu0 %448 }
  0xf7   : > { %2013 = vmatprep.mubr.msk.f32.mxu0 %vm256_vm2, %v449_v14 }
  0xfa   : > { %v830_v15 = vpop.xlane.xlu1 %829  ;;  %v453_v25 = vpop.permute.xlu0 %452 }
  0xfb   : > { %v831_v16 = vrot.slane %v830_v15, 4 }
  0xfd   : > { %v832_v17 = vadd.f32 %v831_v16, %v830_v15 }
  0xfe   : > { %v248_v18 = vpop.permute.xlu1 %247 }
  0xff   : > { %v833_v19 = vrot.slane %v832_v17, 2  ;;  %1998 = vmatmul.mubr.msk.f32.vlgmr.msra.gmra.mrb[0].mxu1 %vm256_vm2, %v248_v18 }
 0x100   : > { %2000 = vmatprep.mubr.msk.f32.mxu1 %vm256_vm2, %v250_v10  ;;  %2020 = vmatpush3.msk.msra.mxu1 %vm265_vm1, %v559_v12 }
 0x101   : > { %v834_v20 = vadd.f32 %v833_v19, %v832_v17  ;;  %2027 = vmatprep.subr.msk.mxu1 %vm265_vm1, %v236_v5 }
 0x102   : > { %v735_v21 = vpop.permute.xlu1 %734 }
 0x103   : > { %v835_v22 = vrot.slane %v834_v20, 1  ;;  %2001 = vmatmul.mubr.msk.f32.gmra.mrb[2].mxu1 %vm256_vm2, %v252_v11 }
 0x104   : > { %2021 = vmatprep.mubr.msk.f32.mxu1 %vm256_vm2, %v246_v9 }
 0x105   : > { %v836_v23 = vadd.f32 %v835_v22, %v834_v20 }
 0x106   : > { %v451_v24 = vpop.permute.xlu1 %450 }
 0x107   : > { %2203 = vpush %v836_v23  ;;  %2022 = vmatmul.mubr.msk.f32.vlgmr.msra.gmra.mrb[4].mxu1 %vm256_vm2, %v248_v18  ;;  %2014 = vmatmul.mubr.msk.f32.vlgmr.msra.gmra.mrb[0].mxu0 %vm256_vm2, %v451_v24  ;;  %v900_v23 = vld [vmem:[#allocation6 + $0x10] sm:$0xff] }
 0x108   : > { %2024 = vmatprep.mubr.msk.f32.mxu1 %vm256_vm2, %v250_v10  ;;  %2028 = vmatpush3.msk.msra.mxu1 %vm265_vm1, %v236_v5 }
 0x109   : > { %2035 = vmatprep.subr.msk.mxu1 %vm265_vm1, %v735_v21  ;;  %2016 = vmatprep.mubr.msk.f32.mxu0 %vm256_vm2, %v453_v25 }
 0x10a   : > { %v455_v26 = vpop.permute.xlu1 %454 }
 0x10b   : > { %2025 = vmatmul.mubr.msk.f32.gmra.mrb[6].mxu1 %vm256_vm2, %v252_v11  ;;  %2017 = vmatmul.mubr.msk.f32.gmra.mrb[2].mxu0 %vm256_vm2, %v455_v26 }
 0x10c   : > { %2029 = vmatprep.mubr.msk.f32.mxu1 %vm256_vm2, %v2660_v2  ;;  %2051 = vmatprep.mubr.msk.f32.mxu0 %vm920_vm5, %v900_v23 }
 0x10e   : > { %v874_v57 = vpop.permute.xlu1 %873 }
 0x10f   : > { %2030 = vmatmul.mubr.msk.f32.vlgmr.msra.gmra.mrb[4].mxu1 %vm256_vm2, %v2669_v6 }
 0x110   : > { %2032 = vmatprep.mubr.msk.f32.mxu1 %vm256_vm2, %v2663_v3  ;;  %2036 = vmatpush3.msk.msra.mxu1 %vm265_vm1, %v735_v21 }
 0x112   : > { %v878_v58 = vpop.permute.xlu1 %877 }
 0x113   : > { %2033 = vmatmul.mubr.msk.f32.gmra.mrb[6].mxu1 %vm256_vm2, %v2666_v4 }
 0x114   : > { %2037 = vmatprep.mubr.msk.f32.mxu1 %vm256_vm2, %v449_v14 }
 0x117   : > { %2038 = vmatmul.mubr.msk.f32.vlgmr.msra.gmra.mrb[4].mxu1 %vm256_vm2, %v451_v24 }
 0x118   : > { %2040 = vmatprep.mubr.msk.f32.mxu1 %vm256_vm2, %v453_v25 }
 0x11b   : > { %2041 = vmatmul.mubr.msk.f32.gmra.mrb[6].mxu1 %vm256_vm2, %v455_v26 }
 0x138   : > { %s2204_s5 = spop %2203 }
 0x139   : > { %v838_v27 = vstv %s2204_s5 }
 0x13a   : > { %v840_v28 = vmul.f32 0.01, %v838_v27 }
 0x13c   : > { %v841_v29 = vsub.f32 %v2654_v0, %v840_v28  ;;  %v882_v0 = vpop.permute.xlu1 %881  ;;  %v2472_v28 = vmov 25  }
 0x13d   : > { %2289 = vset.pattern.permute.xlu1 %v2472_v28  ;;  %2290 = vset.pattern.permute.xlu0 %v2472_v28 }
 0x13e   : > { %v842_v30 = vmul.f32 %v841_v29, %v841_v29 }
 0x140   : > { %v843_v31 = vsel %vm827_vm0, %v842_v30, 0.0  ;;  %v886_v14 = vpop.permute.xlu1 %885 }
 0x141   : > { %844 = vadd.xlane.f32.xlu0 %v843_v31 }
 0x157   : > { %1124 = vperm.xlu0 %2290, %v2663_v3  }
 0x1ce   : > { %v845_v32 = vpop.xlane.xlu0 %844 }
 0x1cf   : > { %v846_v33 = vrot.slane %v845_v32, 4 }
 0x1d1   : > { %v847_v34 = vadd.f32 %v846_v33, %v845_v32 }
 0x1d2   : > { %v1999_v35 = vpop.f32.mrb[0].mxu1 }
 0x1d3   : > { %v848_v36 = vrot.slane %v847_v34, 2  ;;  %v334_v37 = vpop.f32.mrb[1].mxu1 }
 0x1d5   : > { %v849_v38 = vadd.f32 %v848_v36, %v847_v34 }
 0x1d6   : > { %v2002_v39 = vpop.f32.mrb[2].mxu1 }
 0x1d7   : > { %v850_v40 = vrot.slane %v849_v38, 1  ;;  %v344_v41 = vpop.f32.mrb[3].mxu1 }
 0x1d9   : > { %v851_v42 = vadd.f32 %v850_v40, %v849_v38  ;;  %v902_v38 = vld [vmem:[#allocation6 + $0x90] sm:$0xff]  ;;  %v896_v40 = vld [vmem:[#allocation6 + $0x8] sm:$0xff] }
 0x1da   : > { %v2015_v43 = vpop.f32.mrb[0].mxu0 }
 0x1db   : > { %2205 = vpush %v851_v42  ;;  %v2175_v44 = vadd.f32 %v2015_v43, %v1999_v35  ;;  %v534_v45 = vpop.f32.mrb[1].mxu0  ;;  %v898_v42 = vld [vmem:[#allocation6 + $0x88] sm:$0xff] }
 0x1dc   : > { %v2176_v46 = vadd.f32 %v534_v45, %v334_v37  ;;  %v901_v37 = vld [vmem:[#allocation6 + $0x50] sm:$0xff]  ;;  %v899_v43 = vld [vmem:[#allocation6 + $0xc8] sm:$0xff] }
 0x1de   : > { %v2018_v47 = vpop.f32.mrb[2].mxu0 }
 0x1df   : > { %v2177_v48 = vadd.f32 %v2018_v47, %v2002_v39  ;;  %v544_v49 = vpop.f32.mrb[3].mxu0  ;;  %v903_v39 = vld [vmem:[#allocation6 + $0xd0] sm:$0xff] }
 0x1e0   : > { %v2178_v50 = vadd.f32 %v544_v49, %v344_v41  ;;  %v897_v41 = vld [vmem:[#allocation6 + $0x48] sm:$0xff] }
 0x1ea   : > { %v2039_v51 = vpop.f32.mrb[4].mxu1 }
 0x1eb   : > { %v804_v52 = vpop.f32.mrb[5].mxu1 }
 0x1ee   : > { %v2042_v53 = vpop.f32.mrb[6].mxu1 }
 0x1ef   : > { %v814_v54 = vpop.f32.mrb[7].mxu1 }
 0x20c   : > { %s2206_s6 = spop %2205 }
 0x20d   : > { %v853_v55 = vstv %s2206_s6 }
 0x20e   : > { %v855_v56 = vmul.f32 0.01010101, %v853_v55 }
 0x210   : > { %2324 = vrsqrt.f32 %v855_v56  ;;  %vm858_vm3 = vcmp.eq.f32.partialorder %v855_v56, inf  ;;  %v861_v61 = vand.u32 2147483648, %v855_v56  ;;  %vm860_vm4 = vcmp.eq.f32.partialorder %v855_v56, 0.0 }
 0x21a   : > { %v2325_v59 = vpop.eup %2324 }
 0x21b   : > { %v857_v60 = vmul.f32 %v2325_v59, %v855_v56 }
 0x21d   : > { %v859_v62 = vsel %vm858_vm3, %v855_v56, %v857_v60 }
 0x21e   : > { %v862_v63 = vsel %vm860_vm4, %v861_v61, %v859_v62 }
 0x21f   : > { %v863_v1 = vmul.f32 2.0, %v862_v63 }
 0x221   : > { %v864_v5 = vmul.f32 %v863_v1, %v804_v52  ;;  %v865_v7 = vmul.f32 %v2039_v51, %v863_v1  ;;  %v866_v8 = vmul.f32 %v863_v1, %v814_v54  ;;  %v867_v9 = vmul.f32 %v2042_v53, %v863_v1  ;;  %v1125_v51 = vpop.permute.xlu0 %1124 }
 0x222   : > { %v2473_v1 = vmov 26  }
 0x223   : > { %v868_v10 = vadd.f32 %v2176_v46, %v864_v5  ;;  %v869_v11 = vadd.f32 %v2175_v44, %v865_v7  ;;  %v870_v12 = vadd.f32 %v2178_v50, %v866_v8  ;;  %v871_v13 = vadd.f32 %v2177_v48, %v867_v9 }
 0x225   : > { %v888_v15 = vadd.f32 %v874_v57, %v868_v10  ;;  %v889_v16 = vadd.f32 %v878_v58, %v869_v11  ;;  %v890_v17 = vadd.f32 %v882_v0, %v870_v12  ;;  %v891_v18 = vadd.f32 %v886_v14, %v871_v13  ;;  %v1143_v57 = vld [vmem:[#allocation6 + $0x20] sm:$0xff] }
 0x226   : > { %2079 = vmatprep.mubr.msk.f32.mxu1 %vm920_vm5, %v1143_v57  ;;  %v1144_v14 = vld [vmem:[#allocation6 + $0x60] sm:$0xff] }
 0x227   : > { %v892_v19 = vmax.f32 %v888_v15, 0.0  ;;  %v893_v20 = vmax.f32 %v889_v16, 0.0  ;;  %v894_v21 = vmax.f32 %v890_v17, 0.0  ;;  %v895_v22 = vmax.f32 %v891_v18, 0.0  ;;  %v1145_v15 = vld [vmem:[#allocation6 + $0xa0] sm:$0xff]  ;;  %v1139_v17 = vld [vmem:[#allocation6 + $0x18] sm:$0xff] }
 0x228   : > { %v1146_v16 = vld [vmem:[#allocation6 + $0xe0] sm:$0xff]  ;;  %v1140_v18 = vld [vmem:[#allocation6 + $0x58] sm:$0xff] }
 0x229   : > { %v2279_v24 = vpack.i.bf16 %v893_v20, %v892_v19  ;;  %v2135_v25 = vpack.c.bf16 %v893_v20, %v892_v19  ;;  %v2284_v26 = vpack.i.bf16 %v895_v22, %v894_v21  ;;  %v2139_v27 = vpack.c.bf16 %v895_v22, %v894_v21  ;;  %v1141_v19 = vld [vmem:[#allocation6 + $0x98] sm:$0xff] }
 0x22a   : > { %v1142_v20 = vld [vmem:[#allocation6 + $0xd8] sm:$0xff] }
 0x22b   : > { %2280 = vrot.lane.b32.xlu1 %v2279_v24, %s2467_s18 }
 0x22f   : > { %2285 = vrot.lane.b32.xlu1 %v2284_v26, %s2467_s18 }
 0x233   : > { %1116 = vperm.xlu1 %2289, %v2660_v2  }
 0x237   : > { %1120 = vperm.xlu1 %2289, %v2669_v6  }
 0x23b   : > { %1128 = vperm.xlu1 %2289, %v2666_v4  }
 0x23f   : > { %2301 = vset.pattern.permute.xlu1 %v2473_v1  ;;  %v1408_v1 = vld [vmem:[#allocation6 + $0xf0] sm:$0xff] }
 0x29d   : > { %v2281_v29 = vpop.permute.xlu1 %2280 }
 0x29e   : > { %v2283_v30 = vunpack.i.h.bf16 %v2281_v29  ;;  %v2282_v31 = vunpack.i.l.bf16 %v2281_v29 }
 0x2a0   : > { %v2127_v32 = vpack.c.bf16 %v2283_v30, %v2282_v31 }
 0x2a1   : > { %v2286_v33 = vpop.permute.xlu1 %2285 }
 0x2a2   : > { %v2288_v34 = vunpack.i.h.bf16 %v2286_v33  ;;  %v2287_v35 = vunpack.i.l.bf16 %v2286_v33  ;;  %2128 = vmatprep.subr.bf16.mxu0 %v2127_v32 }
 0x2a3   : > { %2130 = vmatpush3.bf16.msra.mxu0 %v2127_v32 }
 0x2a4   : > { %v2131_v36 = vpack.c.bf16 %v2288_v34, %v2287_v35 }
 0x2a6   : > { %2132 = vmatprep.subr.bf16.mxu0 %v2131_v36 }
 0x2a7   : > { %2134 = vmatpush3.bf16.msra.mxu0 %v2131_v36 }
 0x2a8   : > { %2136 = vmatprep.subr.bf16.mxu0 %v2135_v25 }
 0x2aa   : > { %2052 = vmatmul.mubr.msk.f32.vlgmr.msra.gmra.mrb[4].mxu0 %vm920_vm5, %v901_v37 }
 0x2ab   : > { %2138 = vmatpush3.bf16.msra.mxu0 %v2135_v25  ;;  %2054 = vmatprep.mubr.msk.f32.mxu0 %vm920_vm5, %v902_v38 }
 0x2ac   : > { %2140 = vmatprep.subr.bf16.mxu0 %v2139_v27 }
 0x2ae   : > { %2055 = vmatmul.mubr.msk.f32.gmra.mrb[6].mxu0 %vm920_vm5, %v903_v39 }
 0x2af   : > { %2142 = vmatpush3.bf16.msra.mxu0 %v2139_v27  ;;  %2065 = vmatprep.mubr.msk.f32.mxu0 %vm920_vm5, %v896_v40 }
 0x2b2   : > { %2066 = vmatmul.mubr.msk.f32.vlgmr.msra.gmra.mrb[4].mxu0 %vm920_vm5, %v897_v41  ;;  %v1117_v44 = vpop.permute.xlu1 %1116 }
 0x2b3   : > { %2068 = vmatprep.mubr.msk.f32.mxu0 %vm920_vm5, %v898_v42 }
 0x2b6   : > { %2069 = vmatmul.mubr.msk.f32.gmra.mrb[6].mxu0 %vm920_vm5, %v899_v43  ;;  %v1121_v45 = vpop.permute.xlu1 %1120 }
 0x2ba   : > { %v1129_v52 = vpop.permute.xlu1 %1128 }
 0x385   : > { %v2067_v46 = vpop.f32.mrb[4].mxu0 }
 0x386   : > { %v1132_v47 = vadd.f32 %v2067_v46, %v1121_v45  ;;  %v1096_v48 = vpop.f32.mrb[5].mxu0  ;;  %v1405_v45 = vld [vmem:[#allocation6 + $0x30] sm:$0xff] }
 0x387   : > { %v1131_v49 = vadd.f32 %v1117_v44, %v1096_v48  ;;  %2107 = vmatprep.mubr.msk.f32.mxu0 %vm920_vm5, %v1405_v45 }
 0x388   : > { %v1136_v50 = vmax.f32 %v1132_v47, 0.0 }
 0x389   : > { %v1135_v53 = vmax.f32 %v1131_v49, 0.0  ;;  %v2070_v54 = vpop.f32.mrb[6].mxu0 }
 0x38a   : > { %v1134_v55 = vadd.f32 %v2070_v54, %v1129_v52  ;;  %v1106_v56 = vpop.f32.mrb[7].mxu0  ;;  %v2474_v54 = vmov 27  }
 0x38b   : > { %v2291_v58 = vpack.i.bf16 %v1136_v50, %v1135_v53  ;;  %v2151_v59 = vpack.c.bf16 %v1136_v50, %v1135_v53  ;;  %v1133_v60 = vadd.f32 %v1125_v51, %v1106_v56  ;;  %2322 = vset.pattern.permute.xlu0 %v2474_v54 }
 0x38c   : > { %v1138_v61 = vmax.f32 %v1134_v55, 0.0  ;;  %1620 = vperm.xlu0 %2322, %v2660_v2  }
 0x38d   : > { %v1137_v62 = vmax.f32 %v1133_v60, 0.0  ;;  %2292 = vrot.lane.b32.xlu1 %v2291_v58, %s2467_s18 }
 0x38f   : > { %v2296_v63 = vpack.i.bf16 %v1138_v61, %v1137_v62  ;;  %v2155_v0 = vpack.c.bf16 %v1138_v61, %v1137_v62 }
 0x390   : > { %1632 = vperm.xlu0 %2322, %v2666_v4  }
 0x391   : > { %2297 = vrot.lane.b32.xlu1 %v2296_v63, %s2467_s18  ;;  %v1406_v63 = vld [vmem:[#allocation6 + $0x70] sm:$0xff] }
 0x395   : > { %1358 = vperm.xlu1 %2301, %v2660_v2  }
 0x399   : > { %1362 = vperm.xlu1 %2301, %v2669_v6  }
 0x39d   : > { %1366 = vperm.xlu1 %2301, %v2663_v3  }
 0x3a1   : > { %1370 = vperm.xlu1 %2301, %v2666_v4  }
 0x3a5   : > { %2323 = vset.pattern.permute.xlu1 %v2474_v54 }
 0x3ff   : > { %v2293_v5 = vpop.permute.xlu1 %2292 }
 0x400   : > { %v2295_v7 = vunpack.i.h.bf16 %v2293_v5  ;;  %v2294_v8 = vunpack.i.l.bf16 %v2293_v5  ;;  %v1401_v5 = vld [vmem:[#allocation6 + $0x28] sm:$0xff] }
 0x402   : > { %v2143_v9 = vpack.c.bf16 %v2295_v7, %v2294_v8  ;;  %v1402_v7 = vld [vmem:[#allocation6 + $0x68] sm:$0xff] }
 0x403   : > { %v2298_v10 = vpop.permute.xlu1 %2297  ;;  %v1403_v8 = vld [vmem:[#allocation6 + $0xa8] sm:$0xff] }
 0x404   : > { %v2300_v11 = vunpack.i.h.bf16 %v2298_v10  ;;  %v2299_v12 = vunpack.i.l.bf16 %v2298_v10  ;;  %2144 = vmatprep.subr.bf16.mxu1 %v2143_v9 }
 0x405   : > { %2146 = vmatpush3.bf16.msra.mxu1 %v2143_v9  ;;  %v1404_v9 = vld [vmem:[#allocation6 + $0xe8] sm:$0xff] }
 0x406   : > { %v2147_v13 = vpack.c.bf16 %v2300_v11, %v2299_v12 }
 0x408   : > { %2148 = vmatprep.subr.bf16.mxu1 %v2147_v13 }
 0x409   : > { %2150 = vmatpush3.bf16.msra.mxu1 %v2147_v13 }
 0x40a   : > { %2152 = vmatprep.subr.bf16.mxu1 %v2151_v59 }
 0x40b   : > { %v1621_v10 = vpop.permute.xlu0 %1620 }
 0x40c   : > { %2080 = vmatmul.mubr.msk.f32.vlgmr.msra.gmra.mrb[8].mxu1 %vm920_vm5, %v1144_v14 }
 0x40d   : > { %2154 = vmatpush3.bf16.msra.mxu1 %v2151_v59  ;;  %2082 = vmatprep.mubr.msk.f32.mxu1 %vm920_vm5, %v1145_v15 }
 0x40e   : > { %2156 = vmatprep.subr.bf16.mxu1 %v2155_v0 }
 0x410   : > { %2083 = vmatmul.mubr.msk.f32.gmra.mrb[10].mxu1 %vm920_vm5, %v1146_v16 }
 0x411   : > { %2158 = vmatpush3.bf16.msra.mxu1 %v2155_v0  ;;  %2093 = vmatprep.mubr.msk.f32.mxu1 %vm920_vm5, %v1139_v17  ;;  %v1407_v0 = vld [vmem:[#allocation6 + $0xb0] sm:$0xff] }
 0x414   : > { %2094 = vmatmul.mubr.msk.f32.vlgmr.msra.gmra.mrb[8].mxu1 %vm920_vm5, %v1140_v18  ;;  %v1359_v21 = vpop.permute.xlu1 %1358  ;;  %v1633_v18 = vpop.permute.xlu0 %1632 }
 0x415   : > { %2096 = vmatprep.mubr.msk.f32.mxu1 %vm920_vm5, %v1141_v19 }
 0x418   : > { %2097 = vmatmul.mubr.msk.f32.gmra.mrb[10].mxu1 %vm920_vm5, %v1142_v20  ;;  %v1363_v22 = vpop.permute.xlu1 %1362 }
 0x41c   : > { %v1367_v23 = vpop.permute.xlu1 %1366 }
 0x420   : > { %v1371_v29 = vpop.permute.xlu1 %1370 }
 0x4e7   : > { %v2095_v24 = vpop.f32.mrb[8].mxu1 }
 0x4e8   : > { %v1374_v25 = vadd.f32 %v2095_v24, %v1363_v22  ;;  %v1338_v26 = vpop.f32.mrb[9].mxu1 }
 0x4e9   : > { %v1373_v27 = vadd.f32 %v1359_v21, %v1338_v26 }
 0x4ea   : > { %v1378_v28 = vmax.f32 %v1374_v25, 0.0 }
 0x4eb   : > { %v1377_v30 = vmax.f32 %v1373_v27, 0.0  ;;  %v2098_v31 = vpop.f32.mrb[10].mxu1  ;;  %v1664_v27 = vld [vmem:[#allocation6 + $0x78] sm:$0xff] }
 0x4ec   : > { %v1376_v32 = vadd.f32 %v2098_v31, %v1371_v29  ;;  %v1348_v33 = vpop.f32.mrb[11].mxu1 }
 0x4ed   : > { %v2302_v34 = vpack.i.bf16 %v1378_v28, %v1377_v30  ;;  %v1375_v35 = vadd.f32 %v1367_v23, %v1348_v33 }
 0x4ee   : > { %v1380_v36 = vmax.f32 %v1376_v32, 0.0 }
 0x4ef   : > { %v1379_v37 = vmax.f32 %v1375_v35, 0.0  ;;  %2303 = vrot.lane.b32.xlu1 %v2302_v34, %s2467_s18  ;;  %v1666_v35 = vld [vmem:[#allocation6 + $0xf8] sm:$0xff] }
 0x4f1   : > { %v2307_v38 = vpack.i.bf16 %v1380_v36, %v1379_v37 }
 0x4f3   : > { %2308 = vrot.lane.b32.xlu1 %v2307_v38, %s2467_s18 }
 0x561   : > { %v2304_v39 = vpop.permute.xlu1 %2303 }
 0x562   : > { %v2306_v40 = vunpack.i.h.bf16 %v2304_v39  ;;  %v2305_v41 = vunpack.i.l.bf16 %v2304_v39  ;;  %v1665_v39 = vld [vmem:[#allocation6 + $0xb8] sm:$0xff] }
 0x564   : > { %v1398_v42 = vmax.f32 %v1378_v28, %v2306_v40  ;;  %v1397_v43 = vmax.f32 %v1377_v30, %v2305_v41  ;;  %v1663_v30 = vld [vmem:[#allocation6 + $0x38] sm:$0xff] }
 0x565   : > { %v2309_v44 = vpop.permute.xlu1 %2308 }
 0x566   : > { %v2311_v46 = vunpack.i.h.bf16 %v2309_v44  ;;  %v2310_v47 = vunpack.i.l.bf16 %v2309_v44  ;;  %v2312_v48 = vpack.i.bf16 %v1398_v42, %v1397_v43  ;;  %v2167_v49 = vpack.c.bf16 %v1398_v42, %v1397_v43 }
 0x568   : > { %v1400_v50 = vmax.f32 %v1380_v36, %v2311_v46  ;;  %v1399_v51 = vmax.f32 %v1379_v37, %v2310_v47  ;;  %2313 = vrot.lane.b32.xlu1 %v2312_v48, %s2469_s29 }
 0x56a   : > { %v2317_v52 = vpack.i.bf16 %v1400_v50, %v1399_v51  ;;  %v2171_v53 = vpack.c.bf16 %v1400_v50, %v1399_v51 }
 0x56c   : > { %2318 = vrot.lane.b32.xlu1 %v2317_v52, %s2469_s29 }
 0x570   : > { %1624 = vperm.xlu1 %2323, %v2669_v6  }
 0x574   : > { %1628 = vperm.xlu1 %2323, %v2663_v3  }
 0x5da   : > { %v2314_v55 = vpop.permute.xlu1 %2313 }
 0x5db   : > { %v2316_v56 = vunpack.i.h.bf16 %v2314_v55  ;;  %v2315_v57 = vunpack.i.l.bf16 %v2314_v55 }
 0x5dd   : > { %v2159_v58 = vpack.c.bf16 %v2316_v56, %v2315_v57 }
 0x5de   : > { %v2319_v59 = vpop.permute.xlu1 %2318 }
 0x5df   : > { %v2321_v60 = vunpack.i.h.bf16 %v2319_v59  ;;  %v2320_v61 = vunpack.i.l.bf16 %v2319_v59  ;;  %2160 = vmatprep.subr.bf16.mxu0 %v2159_v58 }
 0x5e0   : > { %2162 = vmatpush3.bf16.msra.mxu0 %v2159_v58 }
 0x5e1   : > { %v2163_v62 = vpack.c.bf16 %v2321_v60, %v2320_v61 }
 0x5e3   : > { %2164 = vmatprep.subr.bf16.mxu0 %v2163_v62 }
 0x5e4   : > { %2166 = vmatpush3.bf16.msra.mxu0 %v2163_v62 }
 0x5e5   : > { %2168 = vmatprep.subr.bf16.mxu0 %v2167_v49 }
 0x5e7   : > { %2108 = vmatmul.mubr.msk.f32.vlgmr.msra.gmra.mrb[8].mxu0 %vm920_vm5, %v1406_v63 }
 0x5e8   : > { %2170 = vmatpush3.bf16.msra.mxu0 %v2167_v49  ;;  %2110 = vmatprep.mubr.msk.f32.mxu0 %vm920_vm5, %v1407_v0 }
 0x5e9   : > { %2172 = vmatprep.subr.bf16.mxu0 %v2171_v53 }
 0x5eb   : > { %2111 = vmatmul.mubr.msk.f32.gmra.mrb[10].mxu0 %vm920_vm5, %v1408_v1 }
 0x5ec   : > { %2174 = vmatpush3.bf16.msra.mxu0 %v2171_v53  ;;  %2121 = vmatprep.mubr.msk.f32.mxu0 %vm920_vm5, %v1401_v5 }
 0x5ef   : > { %2122 = vmatmul.mubr.msk.f32.vlgmr.msra.gmra.mrb[8].mxu0 %vm920_vm5, %v1402_v7  ;;  %v1625_v11 = vpop.permute.xlu1 %1624 }
 0x5f0   : > { %2124 = vmatprep.mubr.msk.f32.mxu0 %vm920_vm5, %v1403_v8  ;;  %v1744_v8 = vld [vmem:[#allocation6] ss:$0 sm:$0xff] }
 0x5f3   : > { %2125 = vmatmul.mubr.msk.f32.gmra.mrb[10].mxu0 %vm920_vm5, %v1404_v9  ;;  %v1629_v20 = vpop.permute.xlu1 %1628 }
 0x6c2   : > { %v2123_v12 = vpop.f32.mrb[8].mxu0 }
 0x6c3   : > { %v1636_v13 = vadd.f32 %v2123_v12, %v1625_v11  ;;  %v1600_v14 = vpop.f32.mrb[9].mxu0 }
 0x6c4   : > { %v1635_v15 = vadd.f32 %v1621_v10, %v1600_v14 }
 0x6c5   : > { %v1640_v16 = vmax.f32 %v1636_v13, 0.0 }
 0x6c6   : > { %v1639_v17 = vmax.f32 %v1635_v15, 0.0  ;;  %v2126_v19 = vpop.f32.mrb[10].mxu0 }
 0x6c7   : > { %v1638_v21 = vadd.f32 %v2126_v19, %v1633_v18  ;;  %1649 = vrot.lane.b32.xlu0 %v1640_v16, %s2469_s29  ;;  %v1610_v22 = vpop.f32.mrb[11].mxu0 }
 0x6c8   : > { %v1637_v23 = vadd.f32 %v1629_v20, %v1610_v22  ;;  %1647 = vrot.lane.b32.xlu1 %v1639_v17, %s2469_s29 }
 0x6c9   : > { %v1642_v24 = vmax.f32 %v1638_v21, 0.0 }
 0x6ca   : > { %v1641_v25 = vmax.f32 %v1637_v23, 0.0  ;;  %v1740_v23 = vlaneseq }
 0x6cb   : > { %1653 = vrot.lane.b32.xlu0 %v1642_v24, %s2469_s29 }
 0x6cc   : > { %1651 = vrot.lane.b32.xlu1 %v1641_v25, %s2469_s29 }
 0x739   : > { %v1650_v26 = vpop.permute.xlu0 %1649 }
 0x73a   : > { %v1660_v28 = vmax.f32 %v1640_v16, %v1650_v26  ;;  %v1648_v29 = vpop.permute.xlu1 %1647 }
 0x73b   : > { %v1659_v31 = vmax.f32 %v1639_v17, %v1648_v29 }
 0x73c   : > { %v1668_v32 = vmul.f32 %v1664_v27, %v1660_v28 }
 0x73d   : > { %v1654_v33 = vpop.permute.xlu0 %1653  ;;  %v1667_v34 = vmul.f32 %v1663_v30, %v1659_v31 }
 0x73e   : > { %v1662_v36 = vmax.f32 %v1642_v24, %v1654_v33  ;;  %v1652_v37 = vpop.permute.xlu1 %1651  ;;  %v1675_v38 = vsel %vm1671_vm6, %v1668_v32, 0.0  ;;  %v1741_v24 = vand.u32 127, %v1740_v23 }
 0x73f   : > { %v1661_v40 = vmax.f32 %v1641_v25, %v1652_v37  ;;  %1676 = vadd.xlane.f32.xlu0 %v1675_v38  ;;  %v1672_v41 = vsel %vm1671_vm6, %v1667_v34, 0.0 }
 0x740   : > { %1673 = vadd.xlane.f32.xlu1 %v1672_v41  ;;  %v1670_v42 = vmul.f32 %v1666_v35, %v1662_v36  ;;  %vm1742_vm8 = vcmp.eq.s32.totalorder %v1741_v24, 0 }
 0x741   : > { %v1669_v43 = vmul.f32 %v1665_v39, %v1661_v40 }
 0x742   : > { %v1681_v44 = vsel %vm1671_vm6, %v1670_v42, 0.0 }
 0x743   : > { %v1678_v45 = vsel %vm1671_vm6, %v1669_v43, 0.0 }
 0x744   : > { %1682 = vadd.xlane.f32.xlu1 %v1681_v44  ;;  %1679 = vadd.xlane.f32.xlu0 %v1678_v45 }
 0x7cc   : > { %v1677_v46 = vpop.xlane.xlu0 %1676 }
 0x7cd   : > { %v1703_v47 = vmul.f32 %v1677_v46, %v2669_v6  ;;  %v1674_v48 = vpop.xlane.xlu1 %1673  ;;  %v1686_v54 = vsel %vm1684_vm7, %v1677_v46, 0.0 }
 0x7ce   : > { %v1702_v49 = vmul.f32 %v1674_v48, %v2660_v2  ;;  %v1685_v55 = vsel %vm1684_vm7, %v1674_v48, 0.0 }
 0x7cf   : > { %1712 = vrot.lane.b32.xlu1 %v1703_v47, %s2475_s7  ;;  %v1687_v56 = vadd.f32 %v1686_v54, %v1685_v55 }
 0x7d0   : > { %1710 = vrot.lane.b32.xlu0 %v1702_v49, %s2475_s7 }
 0x7d1   : > { %v1680_v50 = vpop.xlane.xlu0 %1679  ;;  %v1683_v51 = vpop.xlane.xlu1 %1682 }
 0x7d2   : > { %v1704_v52 = vmul.f32 %v1680_v50, %v2663_v3  ;;  %v1705_v53 = vmul.f32 %v1683_v51, %v2666_v4  ;;  %v1688_v6 = vsel %vm1684_vm7, %v1680_v50, 0.0  ;;  %v1690_v57 = vsel %vm1684_vm7, %v1683_v51, 0.0 }
 0x7d3   : > { %v1689_v2 = vadd.f32 %v1688_v6, %v1687_v56 }
 0x7d4   : > { %1714 = vrot.lane.b32.xlu1 %v1704_v52, %s2475_s7  ;;  %1716 = vrot.lane.b32.xlu0 %v1705_v53, %s2475_s7 }
 0x7d5   : > { %v1691_v58 = vadd.f32 %v1690_v57, %v1689_v2 }
 0x7f8   : > { %1692 = vadd.xlane.f32.xlu1 %v1691_v58 }
 0x841   : > { %v1713_v59 = vpop.permute.xlu1 %1712 }
 0x842   : > { %v1711_v60 = vpop.permute.xlu0 %1710  ;;  %v1723_v3 = vsel %vm1684_vm7, %v1713_v59, 0.0 }
 0x843   : > { %v1722_v4 = vsel %vm1684_vm7, %v1711_v60, 0.0 }
 0x844   : > { %v1724_v61 = vadd.f32 %v1723_v3, %v1722_v4 }
 0x846   : > { %v1717_v62 = vpop.permute.xlu0 %1716  ;;  %v1715_v63 = vpop.permute.xlu1 %1714 }
 0x847   : > { %v1725_v0 = vsel %vm1684_vm7, %v1715_v63, 0.0  ;;  %v1727_v5 = vsel %vm1684_vm7, %v1717_v62, 0.0 }
 0x848   : > { %v1726_v1 = vadd.f32 %v1725_v0, %v1724_v61 }
 0x84a   : > { %v1728_v7 = vadd.f32 %v1727_v5, %v1726_v1 }
 0x84c   : > { %1729 = vadd.xlane.f32.xlu0 %v1728_v7 }
 0x862   : > { %1746 = vrot.lane.b32.xlu0 %v1744_v8, %s2476_s8 }
 0x885   : > { %v1693_v9 = vpop.xlane.xlu1 %1692 }
 0x886   : > { %v1694_v10 = vrot.slane %v1693_v9, 4 }
 0x888   : > { %v1695_v11 = vadd.f32 %v1694_v10, %v1693_v9 }
 0x88a   : > { %v1696_v12 = vrot.slane %v1695_v11, 2 }
 0x88c   : > { %v1697_v13 = vadd.f32 %v1696_v12, %v1695_v11 }
 0x88e   : > { %v1698_v14 = vrot.slane %v1697_v13, 1 }
 0x890   : > { %v1699_v15 = vadd.f32 %v1698_v14, %v1697_v13 }
 0x892   : > { %2207 = vpush %v1699_v15 }
 0x8c3   : > { %s2208_s9 = spop %2207 }
 0x8c4   : > { %v1701_v25 = vstv %s2208_s9 }
 0x8d9   : > { %v1730_v16 = vpop.xlane.xlu0 %1729 }
 0x8da   : > { %v1731_v17 = vrot.slane %v1730_v16, 4 }
 0x8dc   : > { %v1732_v18 = vadd.f32 %v1731_v17, %v1730_v16 }
 0x8dd   : > { %v1747_v28 = vpop.permute.xlu0 %1746 }
 0x8de   : > { %v1733_v19 = vrot.slane %v1732_v18, 2 }
 0x8e0   : > { %v1734_v20 = vadd.f32 %v1733_v19, %v1732_v18 }
 0x8e2   : > { %v1735_v21 = vrot.slane %v1734_v20, 1 }
 0x8e4   : > { %v1736_v22 = vadd.f32 %v1735_v21, %v1734_v20 }
 0x8e6   : > { %2209 = vpush %v1736_v22 }
 0x917   : > { %s2210_s25 = spop %2209 }
 0x918   : > { %v1738_v26 = vstv %s2210_s25 }
 0x919   : > { %v1739_v27 = vsub.f32 %v1701_v25, %v1738_v26 }
 0x91b   : > { %v1743_v29 = vsel %vm1742_vm8, %v1738_v26, %v1739_v27 }
 0x91c   : > { %v1749_v30 = vadd.f32 %v1747_v28, %v1743_v29 }
 0x91e   : > { %v1750_v31 = vsub.f32 0.0, %v1749_v30 }
 0x920   : > { %v1751_v32 = vmul.f32 1.442695, %v1750_v31 }
 0x922   : > { %2326 = vpow2.f32 %v1751_v32 }
 0x92c   : > { %v2327_v33 = vpop.eup %2326 }
 0x92d   : > { %v1753_v34 = vadd.f32 1.0, %v2327_v33 }
 0x92f   : > { %2328 = vrcp.f32 %v1753_v34 }
 0x939   : > { %v2329_v35 = vpop.eup %2328 }
 0x93a   : > { %1757 = vst.msk [vmem:[%s234_s12] sm:$0x1] %vm1756_vm9, %v2329_v35 }
 0x93b PF: > { %p16_p9 = scmp.ge.s32.totalorder %s2541_s22, 10   ;;  %s2829_s12 = smov %s2452_s13 }
 0x93c   : > { %s2830_s13 = smov %s2456_s14  ;;  %s2831_s14 = smov %s2567_s10 }
 0x93d   : > { %s2832_s15 = smov %s2541_s22  ;;  %18 = sbr.rel (!%p16_p9) target bundleno = 5 (0x5), region = 89 }
 0x944   :  { %1775 = vsyncpa [#allocation3], 1 }
 0x945   :  { %1777 = vsyncpa [#allocation3 + $0x1], 1 }
 0x946   :  { %1778 = vsyncpa [#allocation5], 1 }
 0x947   :  { %1780 = vsyncpa [#allocation5 + $0x1], 1 }

</bundles_post_ra>
